<compile_context>
chip_gen: v5e
topology: v5e:2x2
jax: 0.10.0
libtpu: 0.0.40
codegen_flags: <defaults>
</compile_context>

<pallas_src>
import jax
import jax.numpy as jnp
from jax.experimental import pallas as pl
from jax.experimental.pallas import tpu as pltpu


# ----------------------------------------------------------------------------- kernels
def _ffn_kernel_resident(x_ref, w1_ref, b1_ref, w2_ref, b2_ref, o_ref):
    # Whole hidden dim resident in VMEM: single fused step, no accumulator.
    # x_ref : (tm, n_embd)   w1_ref: (n_embd, hidden)   b1_ref: (1, hidden)
    # w2_ref: (hidden, n_embd)  b2_ref: (1, n_embd)     o_ref : (tm, n_embd)
    h = jnp.dot(x_ref[...], w1_ref[...], preferred_element_type=jnp.float32)
    h = jnp.maximum(h + b1_ref[...], 0.0)
    out = jnp.dot(h.astype(w2_ref.dtype), w2_ref[...],
                  preferred_element_type=jnp.float32)
    # Dropout(p=0.0) == identity
    o_ref[...] = (out + b2_ref[...]).astype(o_ref.dtype)


def _ffn_kernel_streaming(x_ref, w1_ref, b1_ref, w2_ref, b2_ref, o_ref, acc_ref):
    # Hidden dim streamed in chunks of tk; f32 accumulator resident across k.
    k = pl.program_id(1)

    @pl.when(k == 0)
    def _init():
        acc_ref[...] = jnp.zeros_like(acc_ref)

    h = jnp.dot(x_ref[...], w1_ref[...], preferred_element_type=jnp.float32)
    h = jnp.maximum(h + b1_ref[...], 0.0)
    acc_ref[...] += jnp.dot(h.astype(w2_ref.dtype), w2_ref[...],
                            preferred_element_type=jnp.float32)

    @pl.when(k == pl.num_programs(1) - 1)
    def _finalize():
        # bias-2 add + downcast only once, after the full reduction.
        o_ref[...] = (acc_ref[...] + b2_ref[...]).astype(o_ref.dtype)


# ----------------------------------------------------------------------------- helpers
def _round_up(a, b):
    return (a + b - 1) // b * b


def _vmem_capacity_bytes():
    """Per-TensorCore VMEM capacity; conservative fallback if the query fails."""
    try:
        info = pltpu.get_tpu_info()
        cap = getattr(info, "vmem_capacity_bytes", None)
        if cap:
            return int(cap)
    except Exception:
        pass
    return 64 << 20  # v7x per-TC size: safe lower bound for any generation


def _working_set_bytes(tm, tk, n_embd, x_sz, w_sz, streaming):
    """Double-buffered VMEM working-set estimate for a (tm, tk) tiling."""
    ws = 2 * tm * n_embd * x_sz                 # x tile (double buffered)
    ws += 2 * tm * n_embd * x_sz                # out tile (double buffered)
    ws += 2 * (n_embd * tk + tk) * w_sz         # W1 chunk + b1 chunk
    ws += 2 * (tk * n_embd + n_embd) * w_sz     # W2 chunk + b2
    ws += tm * tk * 4                           # f32 hidden intermediate
    if streaming:
        ws += tm * n_embd * 4                   # f32 accumulator scratch
    return ws


def _select_tiles(M, n_embd, hidden, x_sz, w_sz, budget):
    """Return (tm, tk, streaming) fitting `budget` bytes of VMEM."""
    sub = {4: 8, 2: 16, 1: 32}.get(x_sz, 8)     # dtype-aware sublane multiple
    m_full = _round_up(M, sub)

    tm_cands = []
    for c in (512, 256, 128, 64, sub):
        t = _round_up(min(c, m_full), sub)
        if t not in tm_cands:
            tm_cands.append(t)
    tm_cands.sort(reverse=True)

    if hidden % 128 == 0:
        tk_cands = [d for d in range(hidden, 0, -128) if hidden % d == 0]
    else:
        tk_cands = [hidden]

    # 1) Resident weights (tk == hidden): weights fetched from HBM exactly once,
    #    no k axis, no accumulator.  Biggest token tile that fits.
    for tm in tm_cands:
        if _working_set_bytes(tm, hidden, n_embd, x_sz, w_sz, False) <= budget:
            return tm, hidden, False

    # 2) Stream the hidden dim.  Maximize tm first (weight HBM traffic ~ 1/tm),
    #    then pick the largest 128-multiple chunk that fits.
    for tm in tm_cands:
        for tk in tk_cands:
            if tk == hidden:
                continue
            if _working_set_bytes(tm, tk, n_embd, x_sz, w_sz, True) <= budget:
                return tm, tk, True

    # 3) Fallback: smallest tiles (compile may still need extra VMEM headroom).
    tk = tk_cands[-1]
    return tm_cands[-1], tk, tk != hidden


# ----------------------------------------------------------------------------- wrapper
@jax.jit
def feed_forward(x, w1, b1, w2, b2):
    """x: (B, T, n_embd) -> (B, T, n_embd).

    Weights stored as (in_features, out_features) (i.e. PyTorch weight transposed).
    Works with f32 or bf16 activations/weights; accumulation is always f32.
    """
    B, T, n_embd = x.shape
    hidden = w1.shape[1]
    M = B * T
    x_sz = jnp.dtype(x.dtype).itemsize
    w_sz = jnp.dtype(w1.dtype).itemsize

    # --- generation-aware VMEM budget ----------------------------------------
    vmem_cap = _vmem_capacity_bytes()
    # Leave headroom for compiler internal scratch: ~40 MiB budget on v7x (64 MiB),
    # ~100 MiB on v5e/v6e (128 MiB).
    budget = vmem_cap - max(24 << 20, vmem_cap // 5)

    tm, tk, streaming = _select_tiles(M, n_embd, hidden, x_sz, w_sz, budget)
    M_pad = _round_up(M, tm)
    grid_m = M_pad // tm

    x2d = x.reshape(M, n_embd)
    if M_pad != M:
        x2d = jnp.pad(x2d, ((0, M_pad - M), (0, 0)))

    ws = _working_set_bytes(tm, tk, n_embd, x_sz, w_sz, streaming)
    vmem_limit = int(min(max(ws + (16 << 20), 32 << 20), vmem_cap - (8 << 20)))

    # --- cost estimate for the XLA scheduler ---------------------------------
    w_bytes = (n_embd * hidden + hidden + hidden * n_embd + n_embd) * w_sz
    weight_fetches = 1 if not streaming else grid_m
    cost = pl.CostEstimate(
        flops=4 * M_pad * hidden * n_embd,        # two matmuls, 2 flops per MAC
        transcendentals=0,
        bytes_accessed=2 * M_pad * n_embd * x_sz + w_bytes * weight_fetches,
    )

    if not streaming:
        # Weights resident in VMEM; constant index_maps -> DMA'd once.
        out2d = pl.pallas_call(
            _ffn_kernel_resident,
            out_shape=jax.ShapeDtypeStruct((M_pad, n_embd), x.dtype),
            grid_spec=pltpu.PrefetchScalarGridSpec(
                num_scalar_prefetch=0,
                grid=(grid_m,),
                in_specs=[
                    pl.BlockSpec((tm, n_embd), lambda i: (i, 0)),        # x tile
                    pl.BlockSpec((n_embd, hidden), lambda i: (0, 0)),    # W1 (resident)
                    pl.BlockSpec((1, hidden), lambda i: (0, 0)),         # b1
                    pl.BlockSpec((hidden, n_embd), lambda i: (0, 0)),    # W2 (resident)
                    pl.BlockSpec((1, n_embd), lambda i: (0, 0)),         # b2
                ],
                out_specs=pl.BlockSpec((tm, n_embd), lambda i: (i, 0)),
            ),
            compiler_params=pltpu.CompilerParams(
                dimension_semantics=("parallel",),
                vmem_limit_bytes=vmem_limit,
            ),
            cost_estimate=cost,
        )(x2d, w1, b1, w2, b2)
    else:
        # Hidden dim streamed; reduction axis last, f32 accumulator in scratch.
        out2d = pl.pallas_call(
            _ffn_kernel_streaming,
            out_shape=jax.ShapeDtypeStruct((M_pad, n_embd), x.dtype),
            grid_spec=pltpu.PrefetchScalarGridSpec(
                num_scalar_prefetch=0,
                grid=(grid_m, hidden // tk),
                in_specs=[
                    pl.BlockSpec((tm, n_embd), lambda i, k: (i, 0)),     # x tile
                    pl.BlockSpec((n_embd, tk), lambda i, k: (0, k)),     # W1 chunk
                    pl.BlockSpec((1, tk), lambda i, k: (0, k)),          # b1 chunk
                    pl.BlockSpec((tk, n_embd), lambda i, k: (k, 0)),     # W2 chunk
                    pl.BlockSpec((1, n_embd), lambda i, k: (0, 0)),      # b2
                ],
                out_specs=pl.BlockSpec((tm, n_embd), lambda i, k: (i, 0)),
                scratch_shapes=[pltpu.VMEM((tm, n_embd), jnp.float32)],
            ),
            compiler_params=pltpu.CompilerParams(
                dimension_semantics=("parallel", "arbitrary"),
                vmem_limit_bytes=vmem_limit,
            ),
            cost_estimate=cost,
        )(x2d, w1, b1, w2, b2)

    if M_pad != M:
        out2d = out2d[:M]
    return out2d.reshape(B, T, n_embd)


# ----------------------------------------------------------------------------- init
def init_params(key, n_embd, dtype=jnp.float32):
    """Deterministic init mimicking nn.Linear default (uniform +-1/sqrt(fan_in))."""
    hidden = 4 * n_embd
    k1, k2, k3, k4 = jax.random.split(key, 4)
    lim1 = 1.0 / jnp.sqrt(jnp.float32(n_embd))
    lim2 = 1.0 / jnp.sqrt(jnp.float32(hidden))
    # stored as (in_features, out_features) == PyTorch weight transposed
    w1 = jax.random.uniform(k1, (n_embd, hidden), dtype, -lim1, lim1)
    b1 = jax.random.uniform(k2, (1, hidden), dtype, -lim1, lim1)
    w2 = jax.random.uniform(k3, (hidden, n_embd), dtype, -lim2, lim2)
    b2 = jax.random.uniform(k4, (1, n_embd), dtype, -lim2, lim2)
    return w1, b1, w2, b2


if __name__ == "__main__":
    key = jax.random.PRNGKey(0)

    # --- f32 check (matches the PyTorch module numerically) -------------------
    B, T, n_embd = 2, 8, 32
    k_x, k_p, k_x2 = jax.random.split(key, 3)
    x = jax.random.normal(k_x, (B, T, n_embd), jnp.float32)
    w1, b1, w2, b2 = init_params(k_p, n_embd)

    out = jax.block_until_ready(feed_forward(x, w1, b1, w2, b2))
    ref = jnp.maximum(x.reshape(-1, n_embd) @ w1 + b1, 0.0) @ w2 + b2
    ref = ref.reshape(B, T, n_embd)
    assert out.shape == (B, T, n_embd)
    assert jnp.allclose(out, ref, atol=1e-5, rtol=1e-5)

    # --- bf16 smoke test (exercises dtype-aware sublane rounding & padding) ---
    Bb, Tb, nb = 2, 12, 64
    xb = jax.random.normal(k_x2, (Bb, Tb, nb), jnp.float32).astype(jnp.bfloat16)
    w1b, b1b, w2b, b2b = init_params(k_p, nb, dtype=jnp.bfloat16)
    outb = jax.block_until_ready(feed_forward(xb, w1b, b1b, w2b, b2b))
    refb = (jnp.maximum(xb.reshape(-1, nb).astype(jnp.float32)
                        @ w1b.astype(jnp.float32) + b1b.astype(jnp.float32), 0.0)
            @ w2b.astype(jnp.float32) + b2b.astype(jnp.float32)).reshape(Bb, Tb, nb)
    assert outb.shape == (Bb, Tb, nb)
    assert jnp.allclose(outb.astype(jnp.float32), refb, atol=1e-1, rtol=1e-1)

    print("KERNEL_OK")
</pallas_src>

<mosaic_0001>
module attributes {stable_mosaic.version = 11 : i64} {
  func.func @_ffn_kernel_resident(%arg0: i32, %arg1: memref<16x32xf32, #tpu.memory_space<vmem>>, %arg2: memref<32x128xf32, #tpu.memory_space<vmem>>, %arg3: memref<1x128xf32, #tpu.memory_space<vmem>>, %arg4: memref<128x32xf32, #tpu.memory_space<vmem>>, %arg5: memref<1x32xf32, #tpu.memory_space<vmem>>, %arg6: memref<16x32xf32, #tpu.memory_space<vmem>>) attributes {dimension_semantics = [#tpu.dimension_semantics<parallel>], iteration_bounds = array<i64: 1>, scalar_prefetch = 0 : i64, scratch_operands = 0 : i64, tpu.core_type = #tpu.core_type<tc>, window_params = [{transform_indices = @transform_0, window_bounds = array<i64: 16, 32>}, {pipeline_mode = #tpu.pipeline_mode<synchronous>, transform_indices = @transform_1, window_bounds = array<i64: 32, 128>}, {pipeline_mode = #tpu.pipeline_mode<synchronous>, transform_indices = @transform_2, window_bounds = array<i64: 1, 128>}, {pipeline_mode = #tpu.pipeline_mode<synchronous>, transform_indices = @transform_3, window_bounds = array<i64: 128, 32>}, {pipeline_mode = #tpu.pipeline_mode<synchronous>, transform_indices = @transform_4, window_bounds = array<i64: 1, 32>}, {transform_indices = @transform_5, window_bounds = array<i64: 16, 32>}]} {
    %c0 = arith.constant 0 : index
    %c0_0 = arith.constant 0 : index
    %0 = vector.load %arg1[%c0, %c0_0] : memref<16x32xf32, #tpu.memory_space<vmem>>, vector<16x32xf32>
    %c0_1 = arith.constant 0 : index
    %c0_2 = arith.constant 0 : index
    %1 = vector.load %arg2[%c0_1, %c0_2] : memref<32x128xf32, #tpu.memory_space<vmem>>, vector<32x128xf32>
    %cst = arith.constant dense<0.000000e+00> : vector<16x128xf32>
    %2 = tpu.matmul %0, %1, %cst {dimension_numbers = #tpu.dot_dimension_numbers<[1], [0], [0], [1], [0, 0, 1, 1], [], []>} : vector<16x32xf32>, vector<32x128xf32>, vector<16x128xf32> -> vector<16x128xf32>
    %c0_3 = arith.constant 0 : index
    %c0_4 = arith.constant 0 : index
    %3 = vector.load %arg3[%c0_3, %c0_4] : memref<1x128xf32, #tpu.memory_space<vmem>>, vector<1x128xf32>
    %4 = vector.broadcast %3 : vector<1x128xf32> to vector<16x128xf32>
    %5 = arith.addf %2, %4 : vector<16x128xf32>
    %cst_5 = arith.constant 0.000000e+00 : f32
    %6 = vector.broadcast %cst_5 : f32 to vector<16x128xf32>
    %7 = arith.maximumf %5, %6 : vector<16x128xf32>
    %c0_6 = arith.constant 0 : index
    %c0_7 = arith.constant 0 : index
    %8 = vector.load %arg4[%c0_6, %c0_7] : memref<128x32xf32, #tpu.memory_space<vmem>>, vector<128x32xf32>
    %cst_8 = arith.constant dense<0.000000e+00> : vector<16x32xf32>
    %9 = tpu.matmul %7, %8, %cst_8 {dimension_numbers = #tpu.dot_dimension_numbers<[1], [0], [0], [1], [0, 0, 1, 1], [], []>} : vector<16x128xf32>, vector<128x32xf32>, vector<16x32xf32> -> vector<16x32xf32>
    %c0_9 = arith.constant 0 : index
    %c0_10 = arith.constant 0 : index
    %10 = vector.load %arg5[%c0_9, %c0_10] : memref<1x32xf32, #tpu.memory_space<vmem>>, vector<1x32xf32>
    %11 = vector.broadcast %10 : vector<1x32xf32> to vector<16x32xf32>
    %12 = arith.addf %9, %11 : vector<16x32xf32>
    %c0_11 = arith.constant 0 : index
    %c0_12 = arith.constant 0 : index
    %13 = vector.load %arg6[%c0_11, %c0_12] : memref<16x32xf32, #tpu.memory_space<vmem>>, vector<16x32xf32>
    tpu.vector_store %arg6[%c0_11, %c0_12], %12 {strides = array<i32>} : memref<16x32xf32, #tpu.memory_space<vmem>>, vector<16x32xf32>,
    return
  }
  func.func @transform_0(%arg0: i32) -> (i32, i32) {
    %c0_i32 = arith.constant 0 : i32
    %c0_i32_0 = arith.constant 0 : i32
    return %arg0, %c0_i32 : i32, i32
  }
  func.func @transform_1(%arg0: i32) -> (i32, i32) {
    %c0_i32 = arith.constant 0 : i32
    %c0_i32_0 = arith.constant 0 : i32
    %c0_i32_1 = arith.constant 0 : i32
    return %c0_i32, %c0_i32_0 : i32, i32
  }
  func.func @transform_2(%arg0: i32) -> (i32, i32) {
    %c0_i32 = arith.constant 0 : i32
    %c0_i32_0 = arith.constant 0 : i32
    %c0_i32_1 = arith.constant 0 : i32
    return %c0_i32, %c0_i32_0 : i32, i32
  }
  func.func @transform_3(%arg0: i32) -> (i32, i32) {
    %c0_i32 = arith.constant 0 : i32
    %c0_i32_0 = arith.constant 0 : i32
    %c0_i32_1 = arith.constant 0 : i32
    return %c0_i32, %c0_i32_0 : i32, i32
  }
  func.func @transform_4(%arg0: i32) -> (i32, i32) {
    %c0_i32 = arith.constant 0 : i32
    %c0_i32_0 = arith.constant 0 : i32
    %c0_i32_1 = arith.constant 0 : i32
    return %c0_i32, %c0_i32_0 : i32, i32
  }
  func.func @transform_5(%arg0: i32) -> (i32, i32) {
    %c0_i32 = arith.constant 0 : i32
    %c0_i32_0 = arith.constant 0 : i32
    return %arg0, %c0_i32 : i32, i32
  }
}

</mosaic_0001>

<bundles_post_ra>
// kernel: feed_forward.1
= control target key start
LH: loop header
LB: loop body
LE: loop exit
PB: predicated region body
PF: predicated region fallthrough
CT: control target
= control target key end

     0   :  { %vm31_vm0 = vcmask 261120   ;;  %s287_s0 = inlined_call_operand.vmem [shape: f32[16,32], index: 0, kind: input, shape index: {}]   ;;  %s288_s1 = inlined_call_operand.vmem [shape: f32[32,128], index: 1, kind: input, shape index: {}]   ;;  %s289_s2 = inlined_call_operand.vmem [shape: f32[1,128], index: 2, kind: input, shape index: {}]   ;;  %s290_s3 = inlined_call_operand.vmem [shape: f32[128,32], index: 3, kind: input, shape index: {}]   ;;  %s291_s4 = inlined_call_operand.vmem [shape: f32[1,32], index: 4, kind: input, shape index: {}]   ;;  %s292_s5 = inlined_call_operand.hbm [shape: f32[16,32], index: 5, kind: output, shape index: {}]  }
   0x1   :  { %v26_v0 = vld [vmem:[%s288_s1 + $0x18] sm:$0xff]  ;;  %v25_v1 = vld [vmem:[%s288_s1 + $0x10] sm:$0xff]  ;;  %v24_v2 = vld [vmem:[%s288_s1 + $0x8] sm:$0xff] }
   0x2   :  { %50 = vmatpush.msra.mxu0 %v26_v0  ;;  %v78_v3 = vld [vmem:[%s290_s3 + $0x78] sm:$0xff]  ;;  %v77_v4 = vld [vmem:[%s290_s3 + $0x70] sm:$0xff]  ;;  %v23_v5 = vld [vmem:[%s288_s1] sm:$0xff] }
   0x3   :  { %83 = vmatpush.msra.mxu1 %v78_v3  ;;  %v76_v6 = vld [vmem:[%s290_s3 + $0x68] sm:$0xff]  ;;  %128 = vmatpush.msra.mxu2 %v78_v3  ;;  %v21_v7 = vld [vmem:[%s287_s0] sm:$0xff] }
   0x4   :  { %51 = vmatpush.msra.mxu0 %v25_v1  ;;  %v75_v8 = vld [vmem:[%s290_s3 + $0x60] sm:$0xff] }
   0x5   :  { %84 = vmatpush.msra.mxu1 %v77_v4  ;;  %129 = vmatpush.msra.mxu2 %v77_v4 }
   0x6   :  { %52 = vmatpush.msra.mxu0 %v24_v2 }
   0x7   :  { %85 = vmatpush.msra.mxu1 %v76_v6 }
   0x8   :  { %53 = vmatpush.msra.mxu0 %v23_v5 }
   0x9   :  { %10 = vsyncpa [#allocation3], 0  ;;  %126 = vmatmul.msk.f32.vlgmr.msra.gmra.mxu0 %vm31_vm0, %v21_v7  ;;  %v74_v9 = vld [vmem:[%s290_s3 + $0x58] sm:$0xff]  ;;  %130 = vmatpush.msra.mxu2 %v76_v6  ;;  %v73_v10 = vld [vmem:[%s290_s3 + $0x50] sm:$0xff]  ;;  %s114_s15 = sshll.u32 %s292_s5, 4  ;;  %s176_s16 = smov 128   ;;  %s115_s15 = int_to_ptr.hbm [resolvable:$true] %s114_s15 }
   0xa   :  { %86 = vmatpush.msra.mxu1 %v75_v8  ;;  %v72_v11 = vld [vmem:[%s290_s3 + $0x48] sm:$0xff]  ;;  %v71_v13 = vld [vmem:[%s290_s3 + $0x40] sm:$0xff]  ;;  %v70_v14 = vld [vmem:[%s290_s3 + $0x38] sm:$0xff]  ;;  %s177_s17 = smov 8  }
   0xb   :  { %131 = vmatpush.msra.mxu2 %v75_v8  ;;  %v22_v12 = vld [vmem:[%s287_s0 + $0x8] sm:$0xff]  ;;  %v69_v15 = vld [vmem:[%s290_s3 + $0x30] sm:$0xff]  ;;  %v67_v17 = vld [vmem:[%s290_s3 + $0x20] sm:$0xff] }
   0xc   :  { %87 = vmatpush.msra.mxu1 %v74_v9  ;;  %v68_v16 = vld [vmem:[%s290_s3 + $0x28] sm:$0xff]  ;;  %v66_v18 = vld [vmem:[%s290_s3 + $0x18] sm:$0xff]  ;;  %v65_v19 = vld [vmem:[%s290_s3 + $0x10] sm:$0xff] }
   0xd   :  { %132 = vmatpush.msra.mxu2 %v74_v9  ;;  %v64_v20 = vld [vmem:[%s290_s3 + $0x8] sm:$0xff]  ;;  %v63_v21 = vld [vmem:[%s290_s3] sm:$0xff]  ;;  %s175_s3 = smov [#allocation2]  }
   0xe   :  { %88 = vmatpush.msra.mxu1 %v73_v10  ;;  %v147_v22 = vld [vmem:[%s289_s2] ss:$0 sm:$0xff]  ;;  %s112_s13 = sshll.u32 %s175_s3, 4  ;;  %s113_s13 = int_to_ptr.vmem [resolvable:$true] %s112_s13 }
   0xf   :  { %133 = vmatpush.msra.mxu2 %v73_v10  ;;  %v148_v29 = vld [vmem:[%s291_s4] ss:$0 sm:$0xff] }
  0x10   :  { %89 = vmatpush.msra.mxu1 %v72_v11 }
  0x11   :  { %127 = vmatmul.msk.f32.gmra.mxu0 %vm31_vm0, %v22_v12  ;;  %134 = vmatpush.msra.mxu2 %v72_v11 }
  0x12   :  { %90 = vmatpush.msra.mxu1 %v71_v13 }
  0x13   :  { %135 = vmatpush.msra.mxu2 %v71_v13 }
  0x14   :  { %91 = vmatpush.msra.mxu1 %v70_v14 }
  0x15   :  { %136 = vmatpush.msra.mxu2 %v70_v14 }
  0x16   :  { %92 = vmatpush.msra.mxu1 %v69_v15 }
  0x17   :  { %137 = vmatpush.msra.mxu2 %v69_v15 }
  0x18   :  { %93 = vmatpush.msra.mxu1 %v68_v16 }
  0x19   :  { %138 = vmatpush.msra.mxu2 %v68_v16 }
  0x1a   :  { %94 = vmatpush.msra.mxu1 %v67_v17 }
  0x1b   :  { %139 = vmatpush.msra.mxu2 %v67_v17 }
  0x1c   :  { %95 = vmatpush.msra.mxu1 %v66_v18 }
  0x1d   :  { %140 = vmatpush.msra.mxu2 %v66_v18 }
  0x1e   :  { %96 = vmatpush.msra.mxu1 %v65_v19 }
  0x1f   :  { %141 = vmatpush.msra.mxu2 %v65_v19 }
  0x20   :  { %97 = vmatpush.msra.mxu1 %v64_v20 }
  0x21   :  { %142 = vmatpush.msra.mxu2 %v64_v20 }
  0x22   :  { %98 = vmatpush.msra.mxu1 %v63_v21 }
  0x23   :  { %143 = vmatpush.msra.mxu2 %v63_v21 }
  0x86   :  { %v55_v23 = vpop.f32.mrf.mxu0 }
  0x87   :  { %v56_v24 = vadd.f32 %v147_v22, %v55_v23 }
  0x89   :  { %v61_v25 = vmax.f32 %v56_v24, 0.0 }
  0x8b   :  { %99 = vmatmul.f32.vlgmr.msra.gmra.mxu1 %v61_v25 }
  0x8e   :  { %v58_v26 = vpop.f32.mrf.mxu0 }
  0x8f   :  { %v59_v27 = vadd.f32 %v147_v22, %v58_v26 }
  0x91   :  { %v62_v28 = vmax.f32 %v59_v27, 0.0 }
  0x93   :  { %102 = vmatmul.f32.vlgmr.msra.gmra.mxu2 %v62_v28 }
 0x108   :  { %v100_v30 = vpop.f32.mrf.mxu1 }
 0x109   :  { %v101_v31 = vadd.f32 %v148_v29, %v100_v30 }
 0x10b   :  { %106 = vst.msk [vmem:[#allocation2] sm:$0xff] %vm31_vm0, %v101_v31 }
 0x116   :  { %v103_v32 = vpop.f32.mrf.mxu2 }
 0x117   :  { %v104_v33 = vadd.f32 %v148_v29, %v103_v32 }
 0x119   :  { %107 = vst.msk [vmem:[#allocation2 + $0x8] sm:$0xff] %vm31_vm0, %v104_v33 }
 0x11a   :  { %120 = dma.vmem_to_hbm [thread:$0]  %s113_s13, 256, %s115_s15, [#allocation3], %s176_s16, %s176_s16, %s177_s17  }
 0x11b   :  { %173 = dma.done.wait [#allocation3], 256  }
 0x11c   :  { %174 = vsyncadd [#allocation3], 4294967040 }
 0x11d   :  { %125 = vsyncpa [#allocation3], 1 }

</bundles_post_ra>
